<compile_context>
chip_gen: v6e
topology: v6e:2x2x1
jax: 0.10.0
libtpu: 0.0.40
codegen_flags: <defaults>
</compile_context>

<pallas_src>
import jax
import jax.numpy as jnp
from jax import lax
from jax.experimental import pallas as pl
from jax.experimental.pallas import tpu as pltpu

# ---- constants from Perception.__init__ defaults ----
SIDE_RATIO = 0.25
SAFE_DISTANCE = 0.5
BETA = 0.6

# ---- problem sizes (small, consistent with a depth frame + a few boxes) ----
H, W = 64, 128          # depth frame
N_MAX = 8               # max number of YOLO boxes (padded)
LANES = 128             # lane-dense padding for box data / output


def perception_kernel(depth_ref, box_ref, nb_ref, out_ref):
    b = pl.program_id(0)

    d = depth_ref[...].astype(jnp.float32)                 # (H, W) f32 (bf16 upcast)
    h, w = d.shape
    side_w = int(w * SIDE_RATIO)
    center_w = w - 2 * side_w
    assert side_w > 0 and center_w > 0, "invalid side_ratio for this frame width"

    # ---- reduce over H first (sublane reductions), then mask over lanes ----
    col_sum = jnp.sum(d, axis=0, keepdims=True)            # (1, W)
    col_min = jnp.min(d, axis=0, keepdims=True)            # (1, W)

    col = lax.broadcasted_iota(jnp.int32, (1, w), 1)
    left_mask = col < side_w
    right_mask = col >= (w - side_w)
    center_mask = jnp.logical_and(jnp.logical_not(left_mask),
                                  jnp.logical_not(right_mask))

    inf = jnp.float32(jnp.inf)

    def region_threshold(mask, count):
        avg = jnp.sum(jnp.where(mask, col_sum, 0.0)) * (1.0 / float(count))
        mn = jnp.min(jnp.where(mask, col_min, inf))
        return BETA * mn + (1.0 - BETA) * avg

    thr_l = region_threshold(left_mask, h * side_w) < SAFE_DISTANCE
    thr_c = region_threshold(center_mask, h * center_w) < SAFE_DISTANCE
    thr_r = region_threshold(right_mask, h * side_w) < SAFE_DISTANCE

    # goal[1]: -0.2 if left blocked, elif right blocked +0.2, else 0
    g1 = jnp.where(thr_l, jnp.float32(-0.2),
                   jnp.where(thr_r, jnp.float32(0.2), jnp.float32(0.0)))
    # goal[0]: 0 if center blocked else 0.2
    g0 = jnp.where(thr_c, jnp.float32(0.0), jnp.float32(0.2))

    # ---- banana-box selection: argmax(conf) -> x_center - 0.5 ----
    nb = nb_ref[b]                                          # int32 scalar (SMEM)
    conf = box_ref[0:1, :]                                  # (1, LANES)
    x_row = box_ref[1:2, :]                                 # (1, LANES)
    idx = lax.broadcasted_iota(jnp.int32, conf.shape, 1)
    valid = idx < nb
    conf_m = jnp.where(valid, conf, -inf)
    cmax = jnp.max(conf_m)
    is_max = jnp.logical_and(valid, conf_m == cmax)
    first_idx = jnp.min(jnp.where(is_max, idx, jnp.int32(LANES)))  # torch.argmax -> first max
    x_best = jnp.sum(jnp.where(idx == first_idx, x_row, 0.0))
    g2 = jnp.where(nb > 0, x_best - 0.5, jnp.float32(0.0))

    # ---- aligned (8,128) lane-dense output tile; goal lives in row 0 ----
    lane = lax.broadcasted_iota(jnp.int32, out_ref.shape, 1)
    out = jnp.where(lane == 0, g0,
                    jnp.where(lane == 1, g1,
                              jnp.where(lane == 2, g2, jnp.float32(0.0))))
    out_ref[...] = out.astype(out_ref.dtype)


def perception_forward(depth_frames, yolo_conf, yolo_xywhn, num_boxes):
    """depth_frames: (B, H, W) f32 or bf16 metric depth
       yolo_conf:    (B, N_MAX) f32 confidences (padded)
       yolo_xywhn:   (B, N_MAX, 4) f32 normalized xywh boxes (padded)
       num_boxes:    (B,) int32, number of valid boxes per frame
       returns goals: (B, 3) f32
    """
    B = depth_frames.shape[0]

    # pack only what the kernel uses: conf row + x-center row, lane-dense (128 wide)
    box = jnp.zeros((B, 2, LANES), jnp.float32)
    box = box.at[:, 0, :N_MAX].set(yolo_conf.astype(jnp.float32))
    box = box.at[:, 1, :N_MAX].set(yolo_xywhn[..., 0].astype(jnp.float32))
    nb = num_boxes.astype(jnp.int32)

    out = pl.pallas_call(
        perception_kernel,
        out_shape=jax.ShapeDtypeStruct((B, 8, LANES), jnp.float32),
        grid_spec=pl.GridSpec(
            grid=(B,),
            in_specs=[
                pl.BlockSpec((None, H, W), lambda b: (b, 0, 0)),
                pl.BlockSpec((None, 2, LANES), lambda b: (b, 0, 0)),
                pl.BlockSpec(memory_space=pltpu.MemorySpace.SMEM),
            ],
            out_specs=pl.BlockSpec((None, 8, LANES), lambda b: (b, 0, 0)),
        ),
        compiler_params=pltpu.CompilerParams(
            dimension_semantics=("parallel",)),
    )(depth_frames, box, nb)
    return out[:, 0, :3]


def perception_ref(depth_frames, yolo_conf, yolo_xywhn, num_boxes):
    """Pure-JAX reference mirroring the PyTorch logic (per frame)."""
    B = depth_frames.shape[0]
    side_w = int(W * SIDE_RATIO)
    goals = []
    for i in range(B):
        d = depth_frames[i].astype(jnp.float32)
        left = d[:, :side_w]
        right = d[:, W - side_w:]
        center = d[:, side_w:W - side_w]
        avg = jnp.array([left.mean(), center.mean(), right.mean()])
        mn = jnp.array([left.min(), center.min(), right.min()])
        thr = (BETA * mn + (1 - BETA) * avg) < SAFE_DISTANCE
        g1 = jnp.where(thr[0], -0.2, jnp.where(thr[2], 0.2, 0.0))
        g0 = jnp.where(thr[1], 0.0, 0.2)
        nbi = int(num_boxes[i])
        if nbi > 0:
            c = yolo_conf[i, :nbi]
            hi = int(jnp.argmax(c))
            g2 = yolo_xywhn[i, hi, 0] - 0.5
        else:
            g2 = jnp.float32(0.0)
        goals.append(jnp.stack([g0, g1, g2]).astype(jnp.float32))
    return jnp.stack(goals)


if __name__ == "__main__":
    key = jax.random.PRNGKey(0)
    kd, kc, kx = jax.random.split(key, 3)
    B = 2
    side_w = int(W * SIDE_RATIO)

    # synthetic metric depth frames (meters)
    depth = jax.random.uniform(kd, (B, H, W), jnp.float32, 0.1, 3.0)
    depth = depth.at[0, :, :side_w].multiply(0.1)            # frame 0: left blocked
    depth = depth.at[1, :, side_w:W - side_w].multiply(0.1)  # frame 1: center blocked
    depth_bf16 = depth.astype(jnp.bfloat16)                  # backbone emits bf16

    # synthetic YOLO banana detections (frame 1 has no detections)
    yolo_conf = jax.random.uniform(kc, (B, N_MAX), jnp.float32, 0.2, 0.9)
    yolo_xywhn = jax.random.uniform(kx, (B, N_MAX, 4), jnp.float32, 0.0, 1.0)
    num_boxes = jnp.array([5, 0], dtype=jnp.int32)

    goals = jax.block_until_ready(
        perception_forward(depth_bf16, yolo_conf, yolo_xywhn, num_boxes))
    ref = perception_ref(depth_bf16, yolo_conf, yolo_xywhn, num_boxes)

    assert goals.shape == (B, 3) and goals.dtype == jnp.float32
    assert jnp.allclose(goals, ref, atol=1e-5, rtol=1e-5), (goals, ref)
    print("KERNEL_OK")
</pallas_src>

<mosaic_0001>
module attributes {stable_mosaic.version = 11 : i64} {
  func.func @perception_kernel(%arg0: i32, %arg1: memref<1x64x128xbf16, #tpu.memory_space<vmem>>, %arg2: memref<1x2x128xf32, #tpu.memory_space<vmem>>, %arg3: memref<2xi32, #tpu.memory_space<smem>>, %arg4: memref<1x8x128xf32, #tpu.memory_space<vmem>>) attributes {dimension_semantics = [#tpu.dimension_semantics<parallel>], iteration_bounds = array<i64: 2>, scalar_prefetch = 0 : i64, scratch_operands = 0 : i64, tpu.core_type = #tpu.core_type<tc>, window_params = [{transform_indices = @transform_0, window_bounds = array<i64: 1, 64, 128>}, {transform_indices = @transform_1, window_bounds = array<i64: 1, 2, 128>}, {transform_indices = @transform_2, window_bounds = array<i64: 2>}, {transform_indices = @transform_3, window_bounds = array<i64: 1, 8, 128>}]} {
    %c0 = arith.constant 0 : index
    %c0_0 = arith.constant 0 : index
    %c0_1 = arith.constant 0 : index
    %0 = vector.load %arg1[%c0, %c0_0, %c0_1] : memref<1x64x128xbf16, #tpu.memory_space<vmem>>, vector<1x64x128xbf16>
    %1 = vector.shape_cast %0 : vector<1x64x128xbf16> to vector<64x128xbf16>
    %2 = arith.extf %1 : vector<64x128xbf16> to vector<64x128xf32>
    %cst = arith.constant dense<0.000000e+00> : vector<128xf32>
    %3 = vector.multi_reduction <add>, %2, %cst [0] : vector<64x128xf32> to vector<128xf32>
    %4 = vector.shape_cast %3 : vector<128xf32> to vector<1x128xf32>
    %cst_2 = arith.constant dense<0x7F800000> : vector<128xf32>
    %5 = vector.multi_reduction <minimumf>, %2, %cst_2 [0] : vector<64x128xf32> to vector<128xf32>
    %6 = vector.shape_cast %5 : vector<128xf32> to vector<1x128xf32>
    %7 = tpu.iota {dimensions = array<i32: 1>} : vector<1x128xi32>
    %c32_i32 = arith.constant 32 : i32
    %8 = vector.broadcast %c32_i32 : i32 to vector<1x128xi32>
    %9 = arith.cmpi slt, %7, %8 : vector<1x128xi32>
    %c96_i32 = arith.constant 96 : i32
    %10 = vector.broadcast %c96_i32 : i32 to vector<1x128xi32>
    %11 = arith.cmpi sge, %7, %10 : vector<1x128xi32>
    %cst_3 = arith.constant dense<true> : vector<1x128xi1>
    %12 = arith.xori %9, %cst_3 : vector<1x128xi1>
    %cst_4 = arith.constant dense<true> : vector<1x128xi1>
    %13 = arith.xori %11, %cst_4 : vector<1x128xi1>
    %14 = arith.andi %12, %13 : vector<1x128xi1>
    %cst_5 = arith.constant 0.000000e+00 : f32
    %15 = vector.broadcast %cst_5 : f32 to vector<1x128xf32>
    %16 = arith.select %9, %4, %15 : vector<1x128xi1>, vector<1x128xf32>
    %17 = vector.shape_cast %16 : vector<1x128xf32> to vector<1x1x128xf32>
    %cst_6 = arith.constant dense<0.000000e+00> : vector<1xf32>
    %18 = vector.multi_reduction <add>, %17, %cst_6 [1, 2] : vector<1x1x128xf32> to vector<1xf32>
    %19 = vector.shape_cast %18 : vector<1xf32> to vector<1x1x1xf32>
    %20 = vector.extract %19[0, 0, 0] : f32 from vector<1x1x1xf32>
    %cst_7 = arith.constant 4.8828125E-4 : f32
    %21 = arith.mulf %20, %cst_7 : f32
    %cst_8 = arith.constant 0x7F800000 : f32
    %22 = vector.broadcast %cst_8 : f32 to vector<1x128xf32>
    %23 = arith.select %9, %6, %22 : vector<1x128xi1>, vector<1x128xf32>
    %24 = vector.shape_cast %23 : vector<1x128xf32> to vector<1x1x128xf32>
    %cst_9 = arith.constant dense<0x7F800000> : vector<1xf32>
    %25 = vector.multi_reduction <minimumf>, %24, %cst_9 [1, 2] : vector<1x1x128xf32> to vector<1xf32>
    %26 = vector.shape_cast %25 : vector<1xf32> to vector<1x1x1xf32>
    %27 = vector.extract %26[0, 0, 0] : f32 from vector<1x1x1xf32>
    %cst_10 = arith.constant 6.000000e-01 : f32
    %28 = arith.mulf %cst_10, %27 : f32
    %cst_11 = arith.constant 4.000000e-01 : f32
    %29 = arith.mulf %cst_11, %21 : f32
    %30 = arith.addf %28, %29 : f32
    %cst_12 = arith.constant 5.000000e-01 : f32
    %31 = arith.cmpf olt, %30, %cst_12 : f32
    %cst_13 = arith.constant 0.000000e+00 : f32
    %32 = vector.broadcast %cst_13 : f32 to vector<1x128xf32>
    %33 = arith.select %14, %4, %32 : vector<1x128xi1>, vector<1x128xf32>
    %34 = vector.shape_cast %33 : vector<1x128xf32> to vector<1x1x128xf32>
    %cst_14 = arith.constant dense<0.000000e+00> : vector<1xf32>
    %35 = vector.multi_reduction <add>, %34, %cst_14 [1, 2] : vector<1x1x128xf32> to vector<1xf32>
    %36 = vector.shape_cast %35 : vector<1xf32> to vector<1x1x1xf32>
    %37 = vector.extract %36[0, 0, 0] : f32 from vector<1x1x1xf32>
    %cst_15 = arith.constant 2.44140625E-4 : f32
    %38 = arith.mulf %37, %cst_15 : f32
    %cst_16 = arith.constant 0x7F800000 : f32
    %39 = vector.broadcast %cst_16 : f32 to vector<1x128xf32>
    %40 = arith.select %14, %6, %39 : vector<1x128xi1>, vector<1x128xf32>
    %41 = vector.shape_cast %40 : vector<1x128xf32> to vector<1x1x128xf32>
    %cst_17 = arith.constant dense<0x7F800000> : vector<1xf32>
    %42 = vector.multi_reduction <minimumf>, %41, %cst_17 [1, 2] : vector<1x1x128xf32> to vector<1xf32>
    %43 = vector.shape_cast %42 : vector<1xf32> to vector<1x1x1xf32>
    %44 = vector.extract %43[0, 0, 0] : f32 from vector<1x1x1xf32>
    %cst_18 = arith.constant 6.000000e-01 : f32
    %45 = arith.mulf %cst_18, %44 : f32
    %cst_19 = arith.constant 4.000000e-01 : f32
    %46 = arith.mulf %cst_19, %38 : f32
    %47 = arith.addf %45, %46 : f32
    %cst_20 = arith.constant 5.000000e-01 : f32
    %48 = arith.cmpf olt, %47, %cst_20 : f32
    %cst_21 = arith.constant 0.000000e+00 : f32
    %49 = vector.broadcast %cst_21 : f32 to vector<1x128xf32>
    %50 = arith.select %11, %4, %49 : vector<1x128xi1>, vector<1x128xf32>
    %51 = vector.shape_cast %50 : vector<1x128xf32> to vector<1x1x128xf32>
    %cst_22 = arith.constant dense<0.000000e+00> : vector<1xf32>
    %52 = vector.multi_reduction <add>, %51, %cst_22 [1, 2] : vector<1x1x128xf32> to vector<1xf32>
    %53 = vector.shape_cast %52 : vector<1xf32> to vector<1x1x1xf32>
    %54 = vector.extract %53[0, 0, 0] : f32 from vector<1x1x1xf32>
    %cst_23 = arith.constant 4.8828125E-4 : f32
    %55 = arith.mulf %54, %cst_23 : f32
    %cst_24 = arith.constant 0x7F800000 : f32
    %56 = vector.broadcast %cst_24 : f32 to vector<1x128xf32>
    %57 = arith.select %11, %6, %56 : vector<1x128xi1>, vector<1x128xf32>
    %58 = vector.shape_cast %57 : vector<1x128xf32> to vector<1x1x128xf32>
    %cst_25 = arith.constant dense<0x7F800000> : vector<1xf32>
    %59 = vector.multi_reduction <minimumf>, %58, %cst_25 [1, 2] : vector<1x1x128xf32> to vector<1xf32>
    %60 = vector.shape_cast %59 : vector<1xf32> to vector<1x1x1xf32>
    %61 = vector.extract %60[0, 0, 0] : f32 from vector<1x1x1xf32>
    %cst_26 = arith.constant 6.000000e-01 : f32
    %62 = arith.mulf %cst_26, %61 : f32
    %cst_27 = arith.constant 4.000000e-01 : f32
    %63 = arith.mulf %cst_27, %55 : f32
    %64 = arith.addf %62, %63 : f32
    %cst_28 = arith.constant 5.000000e-01 : f32
    %65 = arith.cmpf olt, %64, %cst_28 : f32
    %cst_29 = arith.constant 2.000000e-01 : f32
    %cst_30 = arith.constant 0.000000e+00 : f32
    %66 = arith.select %65, %cst_29, %cst_30 : f32
    %cst_31 = arith.constant -2.000000e-01 : f32
    %67 = arith.select %31, %cst_31, %66 : f32
    %cst_32 = arith.constant 0.000000e+00 : f32
    %cst_33 = arith.constant 2.000000e-01 : f32
    %68 = arith.select %48, %cst_32, %cst_33 : f32
    %69 = arith.index_cast %arg0 : i32 to index
    %70 = memref.load %arg3[%69] : memref<2xi32, #tpu.memory_space<smem>>
    %c0_34 = arith.constant 0 : index
    %c0_35 = arith.constant 0 : index
    %c0_36 = arith.constant 0 : index
    %71 = vector.load %arg2[%c0_34, %c0_35, %c0_36] : memref<1x2x128xf32, #tpu.memory_space<vmem>>, vector<1x1x128xf32>
    %72 = vector.shape_cast %71 : vector<1x1x128xf32> to vector<1x128xf32>
    %c0_37 = arith.constant 0 : index
    %c1 = arith.constant 1 : index
    %c0_38 = arith.constant 0 : index
    %73 = vector.load %arg2[%c0_37, %c1, %c0_38] : memref<1x2x128xf32, #tpu.memory_space<vmem>>, vector<1x1x128xf32>
    %74 = vector.shape_cast %73 : vector<1x1x128xf32> to vector<1x128xf32>
    %75 = tpu.iota {dimensions = array<i32: 1>} : vector<1x128xi32>
    %76 = vector.broadcast %70 : i32 to vector<1x128xi32>
    %77 = arith.cmpi slt, %75, %76 : vector<1x128xi32>
    %cst_39 = arith.constant 0.000000e+00 : f32
    %cst_40 = arith.constant 0x7F800000 : f32
    %78 = arith.subf %cst_39, %cst_40 : f32
    %79 = vector.broadcast %78 : f32 to vector<1x128xf32>
    %80 = arith.select %77, %72, %79 : vector<1x128xi1>, vector<1x128xf32>
    %81 = vector.shape_cast %80 : vector<1x128xf32> to vector<1x1x128xf32>
    %cst_41 = arith.constant dense<0xFF800000> : vector<1xf32>
    %82 = vector.multi_reduction <maximumf>, %81, %cst_41 [1, 2] : vector<1x1x128xf32> to vector<1xf32>
    %83 = vector.shape_cast %82 : vector<1xf32> to vector<1x1x1xf32>
    %84 = vector.extract %83[0, 0, 0] : f32 from vector<1x1x1xf32>
    %85 = vector.broadcast %84 : f32 to vector<1x128xf32>
    %86 = arith.cmpf oeq, %80, %85 : vector<1x128xf32>
    %87 = arith.andi %77, %86 : vector<1x128xi1>
    %c128_i32 = arith.constant 128 : i32
    %88 = vector.broadcast %c128_i32 : i32 to vector<1x128xi32>
    %89 = arith.select %87, %75, %88 : vector<1x128xi1>, vector<1x128xi32>
    %90 = vector.shape_cast %89 : vector<1x128xi32> to vector<1x1x128xi32>
    %cst_42 = arith.constant dense<2147483647> : vector<1xi32>
    %91 = vector.multi_reduction <minsi>, %90, %cst_42 [1, 2] : vector<1x1x128xi32> to vector<1xi32>
    %92 = vector.shape_cast %91 : vector<1xi32> to vector<1x1x1xi32>
    %93 = vector.extract %92[0, 0, 0] : i32 from vector<1x1x1xi32>
    %94 = vector.broadcast %93 : i32 to vector<1x128xi32>
    %95 = arith.cmpi eq, %75, %94 : vector<1x128xi32>
    %cst_43 = arith.constant 0.000000e+00 : f32
    %96 = vector.broadcast %cst_43 : f32 to vector<1x128xf32>
    %97 = arith.select %95, %74, %96 : vector<1x128xi1>, vector<1x128xf32>
    %98 = vector.shape_cast %97 : vector<1x128xf32> to vector<1x1x128xf32>
    %cst_44 = arith.constant dense<0.000000e+00> : vector<1xf32>
    %99 = vector.multi_reduction <add>, %98, %cst_44 [1, 2] : vector<1x1x128xf32> to vector<1xf32>
    %100 = vector.shape_cast %99 : vector<1xf32> to vector<1x1x1xf32>
    %101 = vector.extract %100[0, 0, 0] : f32 from vector<1x1x1xf32>
    %c0_i32 = arith.constant 0 : i32
    %102 = arith.cmpi sgt, %70, %c0_i32 : i32
    %cst_45 = arith.constant 5.000000e-01 : f32
    %103 = arith.subf %101, %cst_45 : f32
    %cst_46 = arith.constant 0.000000e+00 : f32
    %104 = arith.select %102, %103, %cst_46 : f32
    %105 = tpu.iota {dimensions = array<i32: 1>} : vector<8x128xi32>
    %c0_i32_47 = arith.constant 0 : i32
    %106 = vector.broadcast %c0_i32_47 : i32 to vector<8x128xi32>
    %107 = arith.cmpi eq, %105, %106 : vector<8x128xi32>
    %c1_i32 = arith.constant 1 : i32
    %108 = vector.broadcast %c1_i32 : i32 to vector<8x128xi32>
    %109 = arith.cmpi eq, %105, %108 : vector<8x128xi32>
    %c2_i32 = arith.constant 2 : i32
    %110 = vector.broadcast %c2_i32 : i32 to vector<8x128xi32>
    %111 = arith.cmpi eq, %105, %110 : vector<8x128xi32>
    %cst_48 = arith.constant 0.000000e+00 : f32
    %112 = vector.broadcast %104 : f32 to vector<8x128xf32>
    %113 = vector.broadcast %cst_48 : f32 to vector<8x128xf32>
    %114 = arith.select %111, %112, %113 : vector<8x128xi1>, vector<8x128xf32>
    %115 = vector.broadcast %67 : f32 to vector<8x128xf32>
    %116 = arith.select %109, %115, %114 : vector<8x128xi1>, vector<8x128xf32>
    %117 = vector.broadcast %68 : f32 to vector<8x128xf32>
    %118 = arith.select %107, %117, %116 : vector<8x128xi1>, vector<8x128xf32>
    %c0_49 = arith.constant 0 : index
    %c0_50 = arith.constant 0 : index
    %c0_51 = arith.constant 0 : index
    %119 = vector.load %arg4[%c0_49, %c0_50, %c0_51] : memref<1x8x128xf32, #tpu.memory_space<vmem>>, vector<1x8x128xf32>
    %120 = vector.shape_cast %119 : vector<1x8x128xf32> to vector<8x128xf32>
    %121 = vector.shape_cast %118 : vector<8x128xf32> to vector<1x8x128xf32>
    tpu.vector_store %arg4[%c0_49, %c0_50, %c0_51], %121 {strides = array<i32>} : memref<1x8x128xf32, #tpu.memory_space<vmem>>, vector<1x8x128xf32>,
    return
  }
  func.func @transform_0(%arg0: i32) -> (i32, i32, i32) {
    %c0_i32 = arith.constant 0 : i32
    %c0_i32_0 = arith.constant 0 : i32
    %c0_i32_1 = arith.constant 0 : i32
    return %arg0, %c0_i32, %c0_i32_0 : i32, i32, i32
  }
  func.func @transform_1(%arg0: i32) -> (i32, i32, i32) {
    %c0_i32 = arith.constant 0 : i32
    %c0_i32_0 = arith.constant 0 : i32
    %c0_i32_1 = arith.constant 0 : i32
    return %arg0, %c0_i32, %c0_i32_0 : i32, i32, i32
  }
  func.func @transform_2(%arg0: i32) -> i32 {
    %c0_i32 = arith.constant 0 : i32
    %c0_i32_0 = arith.constant 0 : i32
    return %c0_i32 : i32
  }
  func.func @transform_3(%arg0: i32) -> (i32, i32, i32) {
    %c0_i32 = arith.constant 0 : i32
    %c0_i32_0 = arith.constant 0 : i32
    %c0_i32_1 = arith.constant 0 : i32
    return %arg0, %c0_i32, %c0_i32_0 : i32, i32, i32
  }
}

</mosaic_0001>

<bundles_post_ra>
// kernel: tpu_custom_call.1
= control target key start
LH: loop header
LB: loop body
LE: loop exit
PB: predicated region body
PF: predicated region fallthrough
CT: control target
= control target key end

     0   :  { %s1129_s0 = inlined_call_operand.hbm [shape: bf16[2,64,128], index: 0, kind: input, shape index: {}]   ;;  %s1130_s1 = inlined_call_operand.hbm [shape: f32[2,2,128], index: 1, kind: input, shape index: {}]   ;;  %s1131_s2 = inlined_call_operand.vmem [shape: s32[2], index: 2, kind: input, shape index: {}]   ;;  %s1132_s3 = inlined_call_operand.hbm [shape: f32[2,8,128], index: 3, kind: output, shape index: {}]  }
   0x1   :  { %1137 = sst [smem:[#allocation15_spill]] %s1129_s0 }
   0x2   :  { %1138 = sst [smem:[#allocation16_spill]] %s1130_s1 }
   0x3   :  { %1139 = sst [smem:[#allocation17_spill]] %s1131_s2 }
   0x4   :  { %8 = vsyncpa [#allocation3], 0 }
   0x5   :  { %10 = vsyncpa [#allocation3 + $0x1], 0 }
   0x6   :  { %11 = vsyncpa [#allocation7], 0 }
   0x7   :  { %13 = vsyncpa [#allocation7 + $0x1], 0 }
   0x8   :  { %14 = vsyncpa [#allocation5], 0 }
   0x9   :  { %15 = vsyncpa [#allocation4], 0 }
   0xa   :  { %17 = vsyncpa [#allocation4 + $0x1], 0  ;;  %s837_s12 = smov 0   ;;  %s839_s13 = smov 0  }
   0xb   :  { %s841_s14 = smov 0   ;;  %s843_s15 = smov 0  }
   0xc LB: > { %s858_s16 = sadd.s32 4294967295, %s808_s15   ;;  %s543_s17 = sadd.s32 4294967294, %s808_s15   ;;  %s808_s15 = sphi %s843_s15, %s1168_s15   ;;  %s804_s14 = sphi %s841_s14, %s1167_s14   ;;  %s800_s13 = sphi %s839_s13, %s1166_s13   ;;  %s796_s12 = sphi %s837_s12, %s1165_s12  }
   0xd   : > { %s862_s18 = sadd.s32 1, %s808_s15   ;;  %s30_s19 = sadd.s32 1, %s804_s14 }
   0xe   : > { %s27_s20 = ssub.s32 %s808_s15, %s862_s18  ;;  %p37_p0 = scmp.ne.s32.totalorder %s804_s14, %s800_s13 }
   0xf   : > { %p28_p1 = scmp.eq.s32.totalorder %s27_s20, 0  ;;  %p38_p2 = scmp.eq.s32.totalorder %s808_s15, 0 }
  0x10   : > { %p43_p3 = scmp.ne.s32.totalorder %s800_s13, %s796_s12  ;;  %p1133_p4 = scmp.eq.s32.totalorder %s858_s16, 0 }
  0x11   : > { %s874_s21 = scalar_select %p28_p1, %s804_s14, %s30_s19  }
  0x12   : > { %p876_p5 = por %p38_p2, %p37_p0  ;;  %p882_p6 = por %p1133_p4, %p43_p3 }
  0x13   : > { %1140 = sst [smem:[#allocation14_spill]] %s874_s21  ;;  %p114_p7 = scmp.eq.s32.totalorder %s858_s16, 1 }
  0x14   : > { %s1142_s23 = scalar_select %p882_p6, 1, 0 }
  0x15   : > { %p120_p8 = scmp.eq.s32.totalorder %s543_s17, 1  ;;  %p544_p9 = scmp.ge.s32.totalorder %s808_s15, 1 }
  0x16   : > { %p127_p10 = scmp.lt.s32.totalorder %s808_s15, 3  ;;  %p889_p11 = por %p114_p7, %p37_p0 }
  0x17   : > { %p893_p12 = por %p120_p8, %p43_p3  ;;  %s1146_s2 = sld [smem:[#allocation17_spill]] }
  0x18   : > { %s1143_s24 = scalar_select %p889_p11, 1, 0 }
  0x19   : > { %s1144_s25 = scalar_select %p893_p12, 1, 0 }
  0x1a   : > { %p897_p13 = pnand %p544_p9, %p127_p10  ;;  %p626_p2 = scmp.lt.s32.totalorder %s808_s15, 2 }
  0x1b   : > { %s915_s4 = sand.u32 1, %s804_s14  }
  0x1c   : > { %s1145_s26 = scalar_select %p897_p13, 1, 0 }
  0x1d   : > { %s140_s29 = sshll.u32 %s1146_s2, 4  ;;  %p610_p1 = pneg %p897_p13  ;;  %s141_s29 = int_to_ptr.vmem [resolvable:$true] %s140_s29 }
  0x1e   : > { %p919_p3 = pnand %p626_p2, %p876_p5  ;;  %s547_s6 = sshll.u32 %s915_s4, 5 }
  0x1f   : > { %p910_p7 = pnand %p610_p1, %p1133_p4  ;;  %s665_s7 = scalar_lea.vmem %s141_s29, 16 }
  0x20   : > { %p666_p8 = scmp.ne.s32.totalorder %s141_s29, %s665_s7  ;;  %p673_p1 = scmp.lt.s32.totalorder %s141_s29, %s141_s29 }
  0x21   : > { %p667_p9 = pneg %p910_p7  ;;  %p674_p4 = scmp.lt.s32.totalorder %s665_s7, %s665_s7 }
  0x23   : > { %p668_p10 = pnand %p667_p9, %p666_p8  ;;  %p675_p12 = por %p674_p4, %p673_p1 }
  0x25   : > { %p669_p0 = pneg %p668_p10 }
  0x27   : > { %p676_p11 = pnand %p675_p12, %p669_p0 }
  0x29   : > { %679 = shalt.err (!%p676_p11)
}
  0x2a   : > { %s810_s8 = smov [#allocation8]   ;;  %s562_s9 = sshll.u32 %s808_s15, 9 }
  0x2b   : > { %613 = dma.vmem_to_smem (!%p910_p7), %s141_s29, 16, %s810_s8, [#allocation5]  }
  0x2c   : > { %s155_s10 = scalar_lea.vmem [#allocation2], %s547_s6  ;;  %s1149_s0 = sld [smem:[#allocation15_spill]] }
  0x2d   : > { %s162_s11 = sshll.u32 %s155_s10, 4  ;;  %s152_s22 = scalar_lea.sflag [#allocation3], %s915_s4  ;;  %s934_s11 = int_to_ptr.vmem [resolvable:$true] %s162_s11 }
  0x2e   : > { %p682_p5 = pneg %p919_p3 }
  0x32   : > { %s932_s20 = scalar_lea.hbm %s1149_s0, %s562_s9  ;;  %s685_s30 = scalar_lea.hbm %s1149_s0, 1024 }
  0x33   : > { %s680_s27 = scalar_lea.hbm %s932_s20, 512  ;;  %p686_p0 = scmp.lt.s32.totalorder %s932_s20, %s1149_s0 }
  0x34   : > { %p681_p4 = scmp.ne.s32.totalorder %s932_s20, %s680_s27  ;;  %p687_p2 = scmp.lt.s32.totalorder %s685_s30, %s680_s27 }
  0x36   : > { %p683_p11 = pnand %p682_p5, %p681_p4  ;;  %p688_p7 = por %p687_p2, %p686_p0 }
  0x38   : > { %p684_p12 = pneg %p683_p11 }
  0x3a   : > { %p689_p8 = pnand %p688_p7, %p684_p12 }
  0x3c   : > { %692 = shalt.err (!%p689_p8)
}
  0x3d   : > { %s693_s8 = scalar_lea.vmem %s934_s11, 512  ;;  %s811_s9 = smov [#allocation2]  }
  0x3e   : > { %p694_p9 = scmp.ne.s32.totalorder %s934_s11, %s693_s8  ;;  %s698_s10 = sshll.u32 %s811_s9, 4  ;;  %s699_s10 = int_to_ptr.vmem [resolvable:$false] %s698_s10 }
  0x3f   : > { %s700_s17 = scalar_lea.vmem %s699_s10, 1024  ;;  %p701_p4 = scmp.lt.s32.totalorder %s934_s11, %s699_s10 }
  0x40   : > { %p696_p10 = pnand %p694_p9, %p682_p5  ;;  %p702_p11 = scmp.lt.s32.totalorder %s700_s17, %s693_s8 }
  0x42   : > { %p697_p1 = pneg %p696_p10  ;;  %p703_p6 = por %p702_p11, %p701_p4 }
  0x44   : > { %p704_p0 = pnand %p703_p6, %p697_p1 }
  0x46   : > { %707 = shalt.err (!%p704_p0)
}
  0x47   : > { %s812_s19 = smov 64   ;;  %s813_s27 = smov 4  }
  0x48   : > { %617 = dma.hbm_to_vmem [thread:$0]  (!%p919_p3), %s932_s20, 512, %s934_s11, %s152_s22, %s812_s19, %s812_s19, %s813_s27  }
  0x49   : > { %s550_s28 = sshll.u32 %s915_s4, 1  ;;  %s551_s29 = sshll.u32 %s808_s15, 5 }
  0x4a   : > { %s1150_s1 = sld [smem:[#allocation16_spill]]  ;;  %s176_s8 = scalar_lea.vmem [#allocation6], %s550_s28 }
  0x4b   : > { %s183_s9 = sshll.u32 %s176_s8, 4  ;;  %s173_s10 = scalar_lea.sflag [#allocation7], %s915_s4  ;;  %s184_s9 = int_to_ptr.vmem [resolvable:$true] %s183_s9 }
  0x50   : > { %s968_s7 = scalar_lea.hbm %s1150_s1, %s551_s29  ;;  %s713_s22 = scalar_lea.hbm %s1150_s1, 64 }
  0x51   : > { %s708_s17 = scalar_lea.hbm %s968_s7, 32  ;;  %p714_p7 = scmp.lt.s32.totalorder %s968_s7, %s1150_s1 }
  0x52   : > { %p709_p6 = scmp.ne.s32.totalorder %s968_s7, %s708_s17  ;;  %p715_p8 = scmp.lt.s32.totalorder %s713_s22, %s708_s17 }
  0x54   : > { %p711_p12 = pnand %p709_p6, %p682_p5  ;;  %p716_p9 = por %p715_p8, %p714_p7 }
  0x56   : > { %p712_p2 = pneg %p711_p12 }
  0x58   : > { %p717_p10 = pnand %p716_p9, %p712_p2 }
  0x5a   : > { %720 = shalt.err (!%p717_p10)
}
  0x5b   : > { %s721_s28 = scalar_lea.vmem %s184_s9, 32  ;;  %s814_s4 = smov [#allocation6]  }
  0x5c   : > { %p722_p1 = scmp.ne.s32.totalorder %s184_s9, %s721_s28  ;;  %s726_s29 = sshll.u32 %s814_s4, 4  ;;  %s727_s29 = int_to_ptr.vmem [resolvable:$false] %s726_s29 }
  0x5d   : > { %s728_s30 = scalar_lea.vmem %s727_s29, 64  ;;  %p729_p0 = scmp.lt.s32.totalorder %s184_s9, %s727_s29 }
  0x5e   : > { %p724_p4 = pnand %p722_p1, %p682_p5  ;;  %p730_p6 = scmp.lt.s32.totalorder %s728_s30, %s721_s28 }
  0x60   : > { %p725_p11 = pneg %p724_p4  ;;  %p731_p12 = por %p730_p6, %p729_p0 }
  0x62   : > { %p732_p13 = pnand %p731_p12, %p725_p11 }
  0x64   : > { %735 = shalt.err (!%p732_p13)
}
  0x65   : > { %620 = dma.hbm_to_vmem [thread:$0]  (!%p919_p3), %s968_s7, 32, %s184_s9, %s173_s10  }
  0x66   : > { %p1151_p2 = scmp.ne.s32.totalorder %s1145_s26, 0 }
  0x67   : > { %s992_s6 = sand.u32 (!%p1151_p2), 1, %s800_s13   ;;  %p1152_p5 = scmp.ne.s32.totalorder (!%p1151_p2), %s1142_s23, 0 }
  0x68   : > { %192 = sbr.rel (%p1151_p2) target bundleno = 936 (0x3a8), region = 32  ;;  %s553_s8 = sshll.u32 (!%p1151_p2), %s992_s6, 5 }
  0x69   : > { %s195_s17 = scalar_lea.sflag (!%p1151_p2), [#allocation3], %s992_s6  ;;  %s198_s11 = scalar_lea.vmem (!%p1151_p2), [#allocation2], %s553_s8 }
  0x6d   : > { %779 = dma.done.wait (%p1152_p5), %s195_s17, 512  }
  0x6e   : > { %781 = vsyncadd (%p1152_p5), %s195_s17, 4294966784  ;;  %s554_s5 = sshll.u32 %s992_s6, 1  ;;  %s204_s26 = scalar_lea.sflag [#allocation7], %s992_s6 }
  0x6f   : > { %s1002_s7 = scalar_lea.vmem [#allocation6], %s554_s5 }
  0x70   : > { %783 = dma.done.wait (%p1152_p5), %s204_s26, 32  }
  0x71   : > { %785 = vsyncadd (%p1152_p5), %s204_s26, 4294967264  ;;  %p1153_p13 = scmp.eq.s32.totalorder %s858_s16, 0 }
  0x73   : > { %787 = dma.done.wait (%p1153_p13), [#allocation5], 16   ;;  %p1154_p3 = pmov %p1153_p13 }
  0x75   : > { %789 = vsyncadd (%p1154_p3), [#allocation5], 4294967280 }
  0x76   : > { %216 = sfence }
  0x77   : > { %v564_v0 = vld [vmem:[%s198_s11] sm:$0xff]   ;;  %v579_v1 = vld [vmem:[%s198_s11 + $0x8] sm:$0xff]   ;;  %v580_v2 = vld [vmem:[%s198_s11 + $0x10] sm:$0xff]   ;;  %v282_v26 = vlaneseq  ;;  %s1013_s23 = sld [smem:[#allocation8 + %s858_s16]]  ;;  %vm815_vm2 = vmmov 1   ;;  %vm290_vm7 = vcmask 1040384  }
  0x78   : > { %v565_v3 = vunpack.c.l.bf16 %v564_v0  ;;  %v566_v4 = vunpack.c.h.bf16 %v564_v0  ;;  %v569_v5 = vunpack.c.l.bf16 %v579_v1  ;;  %v570_v6 = vunpack.c.h.bf16 %v579_v1  ;;  %v581_v7 = vld [vmem:[%s198_s11 + $0x18] sm:$0xff]   ;;  %v354_v40 = vld [vmem:[%s1002_s7] sm:$0x1]  ;;  %p1161_p4 = scmp.ne.s32.totalorder %s1143_s24, 0 }
  0x79   : > { %v573_v8 = vunpack.c.l.bf16 %v580_v2  ;;  %v574_v9 = vunpack.c.h.bf16 %v580_v2  ;;  %v577_v10 = vunpack.c.l.bf16 %v581_v7  ;;  %v578_v11 = vunpack.c.h.bf16 %v581_v7 }
  0x7a   : > { %v256_v12 = vadd.f32 %v566_v4, %v565_v3  ;;  %v1015_v30 = vand.u32 127, %v282_v26 }
  0x7b   : > { %v269_v13 = vmin.f32 %v565_v3, %v573_v8  ;;  %v270_v14 = vmin.f32 %v566_v4, %v574_v9  ;;  %v271_v15 = vmin.f32 %v569_v5, %v577_v10  ;;  %v272_v16 = vmin.f32 %v570_v6, %v578_v11 }
  0x7c   : > { %v257_v17 = vadd.f32 %v569_v5, %v256_v12  ;;  %vm284_vm0 = vcmp.lt.s32.totalorder %v1015_v30, 32  ;;  %vm285_vm1 = vcmp.ge.s32.totalorder %v1015_v30, 96  ;;  %vm416_vm15 = vcmp.eq.s32.totalorder %v1015_v30, 2 }
  0x7d   : > { %v273_v18 = vmin.f32 %v269_v13, %v270_v14  ;;  %v274_v19 = vmin.f32 %v271_v15, %v272_v16  ;;  %vm1021_vm3 = vmxor %vm284_vm0, %vm815_vm2  ;;  %v356_v36 = vstv %s1013_s23  ;;  %p411_p10 = scmp.gt.s32.totalorder %s1013_s23, 0 }
  0x7e   : > { %v258_v20 = vadd.f32 %v570_v6, %v257_v17  ;;  %vm1028_vm4 = vmxor %vm285_vm1, %vm815_vm2  ;;  %vm1034_vm5 = vcmp.lt.s32.totalorder %v1015_v30, %v356_v36 }
  0x7f   : > { %v275_v21 = vmin.f32 %v273_v18, %v274_v19  ;;  %vm288_vm6 = vmand %vm1021_vm3, %vm1028_vm4  ;;  %v1048_v46 = vsel %vm1034_vm5, %v354_v40, -inf }
  0x80   : > { %v259_v22 = vadd.f32 %v573_v8, %v258_v20  ;;  %v359_v50 = vsel %vm290_vm7, %v1048_v46, -inf }
  0x81   : > { %v276_v24 = vrot.slane %v275_v21, 4 }
  0x82   : > { %v260_v23 = vadd.f32 %v574_v9, %v259_v22 }
  0x83   : > { %v277_v28 = vmin.f32 %v275_v21, %v276_v24 }
  0x84   : > { %v261_v25 = vadd.f32 %v577_v10, %v260_v23 }
  0x85   : > { %v278_v32 = vrot.slane %v277_v28, 2 }
  0x86   : > { %v262_v27 = vadd.f32 %v578_v11, %v261_v25 }
  0x87   : > { %v279_v38 = vmin.f32 %v277_v28, %v278_v32 }
  0x88   : > { %v263_v29 = vrot.slane %v262_v27, 4 }
  0x89   : > { %v280_v43 = vrot.slane %v279_v38, 1 }
  0x8a   : > { %v264_v31 = vadd.f32 %v263_v29, %v262_v27 }
  0x8b   : > { %v281_v52 = vmin.f32 %v279_v38, %v280_v43 }
  0x8c   : > { %v265_v33 = vrot.slane %v264_v31, 2 }
  0x8d   : > { %v302_v53 = vsel %vm284_vm0, %v281_v52, inf  ;;  %v322_v54 = vsel %vm288_vm6, %v281_v52, inf  ;;  %v342_v55 = vsel %vm285_vm1, %v281_v52, inf }
  0x8e   : > { %v266_v35 = vadd.f32 %v265_v33, %v264_v31 }
  0x90   : > { %v267_v39 = vrot.slane %v266_v35, 1 }
  0x92   : > { %v268_v42 = vadd.f32 %v267_v39, %v266_v35 }
  0x94   : > { %v330_v44 = vsel %vm285_vm1, %v268_v42, 0.0  ;;  %v289_v45 = vsel %vm284_vm0, %v268_v42, 0.0  ;;  %v310_v47 = vsel %vm288_vm6, %v268_v42, 0.0  ;;  %vm415_vm0 = vcmp.eq.s32.totalorder %v1015_v30, 1 }
  0x95   : > { %v331_v48 = vsel %vm290_vm7, %v330_v44, 0.0  ;;  %v291_v49 = vsel %vm290_vm7, %v289_v45, 0.0  ;;  %v311_v51 = vsel %vm290_vm7, %v310_v47, 0.0  ;;  %v355_v44 = vld [vmem:[%s1002_s7 + $0x1] sm:$0x1]  ;;  %vm414_vm1 = vcmp.eq.s32.totalorder %v1015_v30, 0 }
  0x96   : > { %332 = vadd.xlane.f32.xlu1 %v331_v48  ;;  %292 = vadd.xlane.f32.xlu0 %v291_v49 }
  0x9a   : > { %360 = vmax.xlane.f32.xlu1 %v359_v50  ;;  %312 = vadd.xlane.f32.xlu0 %v311_v51 }
  0x9e   : > { %303 = vmin.xlane.f32.xlu0 %v302_v53  ;;  %323 = vmin.xlane.f32.xlu1 %v322_v54 }
  0xa2   : > { %343 = vmin.xlane.f32.xlu0 %v342_v55 }
 0x11f   : > { %v333_v56 = vpop.xlane.xlu1 %332  ;;  %v293_v57 = vpop.xlane.xlu0 %292 }
 0x120   : > { %v334_v58 = vrot.slane %v333_v56, 4  ;;  %v294_v59 = vrot.slane %v293_v57, 4 }
 0x122   : > { %v335_v60 = vadd.f32 %v334_v58, %v333_v56  ;;  %v295_v61 = vadd.f32 %v294_v59, %v293_v57 }
 0x123   : > { %v361_v62 = vpop.xlane.xlu1 %360  ;;  %v313_v63 = vpop.xlane.xlu0 %312 }
 0x124   : > { %v336_v0 = vrot.slane %v335_v60, 2  ;;  %v296_v1 = vrot.slane %v295_v61, 2  ;;  %v362_v2 = vrot.slane %v361_v62, 4  ;;  %v314_v3 = vrot.slane %v313_v63, 4 }
 0x126   : > { %v363_v4 = vmax.f32 %v361_v62, %v362_v2  ;;  %v315_v5 = vadd.f32 %v314_v3, %v313_v63  ;;  %v297_v6 = vadd.f32 %v296_v1, %v295_v61  ;;  %v337_v10 = vadd.f32 %v336_v0, %v335_v60 }
 0x127   : > { %v304_v11 = vpop.xlane.xlu0 %303  ;;  %v324_v18 = vpop.xlane.xlu1 %323 }
 0x128   : > { %v364_v7 = vrot.slane %v363_v4, 2  ;;  %v316_v8 = vrot.slane %v315_v5, 2  ;;  %v298_v9 = vrot.slane %v297_v6, 1  ;;  %v338_v16 = vrot.slane %v337_v10, 1 }
 0x12a   : > { %v299_v12 = vadd.f32 %v298_v9, %v297_v6  ;;  %v317_v13 = vadd.f32 %v316_v8, %v315_v5  ;;  %v365_v14 = vmax.f32 %v363_v4, %v364_v7  ;;  %v339_v21 = vadd.f32 %v338_v16, %v337_v10 }
 0x12b   : > { %v344_v20 = vpop.xlane.xlu0 %343 }
 0x12c   : > { %582 = vpush %v299_v12  ;;  %v318_v15 = vrot.slane %v317_v13, 1  ;;  %v366_v17 = vrot.slane %v365_v14, 1 }
 0x12d   : > { %584 = vpush %v304_v11 }
 0x12e   : > { %v319_v19 = vadd.f32 %v318_v15, %v317_v13  ;;  %v367_v22 = vmax.f32 %v365_v14, %v366_v17 }
 0x130   : > { %586 = vpush %v319_v19 }
 0x131   : > { %588 = vpush %v324_v18 }
 0x132   : > { %590 = vpush %v339_v21 }
 0x133   : > { %592 = vpush %v344_v20 }
 0x134   : > { %594 = vpush %v367_v22 }
 0x15d   : > { %s583_s9 = spop %582 }
 0x15e   : > { %s301_s10 = smul.f32 0.00048828125, %s583_s9  ;;  %s585_s20 = spop %584 }
 0x15f   : > { %s306_s22 = smul.f32 0.6, %s585_s20 }
 0x160   : > { %s307_s19 = smul.f32 0.4, %s301_s10  ;;  %s559_s10 = sshll.u32 %s858_s16, 7 }
 0x161   : > { %s587_s27 = spop %586 }
 0x162   : > { %s308_s28 = sadd.f32 %s307_s19, %s306_s22  ;;  %s321_s4 = smul.f32 0.00024414063, %s587_s27 }
 0x163   : > { %s589_s29 = spop %588  ;;  %s1092_s27 = scalar_lea.hbm %s1132_s3, %s559_s10 }
 0x164   : > { %s327_s30 = smul.f32 0.4, %s321_s4  ;;  %s591_s17 = spop %590 }
 0x165   : > { %s326_s8 = smul.f32 0.6, %s589_s29  ;;  %s593_s5 = spop %592 }
 0x166   : > { %s341_s11 = smul.f32 0.00048828125, %s591_s17  ;;  %s595_s2 = spop %594 }
 0x167   : > { %s1069_s26 = sadd.f32 %s327_s30, %s326_s8  ;;  %s346_s0 = smul.f32 0.6, %s593_s5  ;;  %v369_v23 = vstv %s595_s2 }
 0x168   : > { %s347_s1 = smul.f32 0.4, %s341_s11  ;;  %vm370_vm8 = vcmp.eq.f32.partialorder %v1048_v46, %v369_v23  ;;  %p309_p8 = scmp.lt.f32.partialorder %s308_s28, 0.5 }
 0x169   : > { %vm371_vm9 = vmand %vm1034_vm5, %vm370_vm8  ;;  %p329_p9 = scmp.lt.f32.partialorder %s1069_s26, 0.5  ;;  %s425_s28 = scalar_lea.sflag [#allocation4], %s992_s6 }
 0x16a   : > { %s348_s21 = sadd.f32 %s347_s1, %s346_s0  ;;  %v372_v24 = vsel %vm371_vm9, %v1015_v30, 128  ;;  %s556_s1 = sshll.u32 %s992_s6, 3 }
 0x16b   : > { %v373_v25 = vsel %vm290_vm7, %v372_v24, 2147483647  ;;  %s352_s7 = scalar_select %p329_p9, 0.0, 0.2 }
 0x16c   : > { %p349_p7 = scmp.lt.f32.partialorder %s348_s21, 0.5  ;;  %v375_v26 = vshra.s32 %v373_v25, 16  ;;  %v374_v28 = vand.u32 65535, %v373_v25  ;;  %s239_s20 = scalar_lea.vmem [#allocation9], %s556_s1 }
 0x16d   : > { %s438_s22 = sshll.u32 %s239_s20, 4  ;;  %v421_v58 = vstv %s352_s7  ;;  %s816_s4 = smov [#allocation9]   ;;  %s439_s22 = int_to_ptr.vmem [resolvable:$true] %s438_s22 }
 0x16e   : > { %s350_s9 = scalar_select %p349_p7, 0.2, 0.0  ;;  %v377_v27 = vcvt.s32.f32 %v375_v26  ;;  %v376_v31 = vcvt.s32.f32 %v374_v28 }
 0x16f   : > { %s736_s16 = scalar_lea.vmem %s439_s22, 128  ;;  %s740_s29 = sshll.u32 %s816_s4, 4  ;;  %s741_s29 = int_to_ptr.vmem [resolvable:$false] %s740_s29 }
 0x170   : > { %s1170_s9 = smov (%p309_p8, %s350_s9), -0.2  ;;  %378 = vmin.xlane.f32.xlu1 %v377_v27  ;;  %p737_p1 = scmp.ne.s32.totalorder %s439_s22, %s736_s16 }
 0x171   : > { %v419_v56 = vstv %s1170_s9  ;;  %s742_s30 = scalar_lea.vmem %s741_s29, 256  ;;  %p743_p6 = scmp.lt.s32.totalorder %s439_s22, %s741_s29 }
 0x172   : > { %p738_p11 = pnand %p737_p1, %p1161_p4  ;;  %p744_p12 = scmp.lt.s32.totalorder %s742_s30, %s736_s16 }
 0x174   : > { %p739_p0 = pneg %p738_p11  ;;  %p745_p2 = por %p744_p12, %p743_p6 }
 0x176   : > { %p746_p5 = pnand %p745_p2, %p739_p0 }
 0x1f9   : > { %v379_v29 = vpop.xlane.xlu1 %378 }
 0x1fa   : > { %vm380_vm10 = vcmp.eq.f32.partialorder %v377_v27, %v379_v29  ;;  %v385_v33 = vcvt.f32.s32 %v379_v29 }
 0x1fb   : > { %v381_v32 = vsel %vm380_vm10, %v376_v31, inf }
 0x1fc   : > { %382 = vmin.xlane.f32.xlu0 %v381_v32  ;;  %v386_v35 = vshll.u32 %v385_v33, 16 }
 0x285   : > { %v383_v34 = vpop.xlane.xlu0 %382 }
 0x286   : > { %v384_v36 = vcvt.f32.s32 %v383_v34 }
 0x288   : > { %v387_v37 = vadd.s32 %v386_v35, %v384_v36 }
 0x28a   : > { %v388_v38 = vrot.slane %v387_v37, 4 }
 0x28c   : > { %vm389_vm11 = vcmp.lt.s32.totalorder %v387_v37, %v388_v38 }
 0x28d   : > { %v390_v39 = vsel %vm389_vm11, %v387_v37, %v388_v38 }
 0x28e   : > { %v391_v40 = vrot.slane %v390_v39, 2 }
 0x290   : > { %vm392_vm12 = vcmp.lt.s32.totalorder %v390_v39, %v391_v40 }
 0x291   : > { %v393_v41 = vsel %vm392_vm12, %v390_v39, %v391_v40 }
 0x292   : > { %v394_v42 = vrot.slane %v393_v41, 1 }
 0x294   : > { %vm395_vm13 = vcmp.lt.s32.totalorder %v393_v41, %v394_v42 }
 0x295   : > { %v396_v43 = vsel %vm395_vm13, %v393_v41, %v394_v42 }
 0x296   : > { %596 = vpush %v396_v43 }
 0x2c7   : > { %s597_s0 = spop %596 }
 0x2c8   : > { %v398_v45 = vstv %s597_s0 }
 0x2c9   : > { %vm399_vm14 = vcmp.eq.s32.totalorder %v1015_v30, %v398_v45 }
 0x2ca   : > { %v400_v46 = vsel %vm399_vm14, %v355_v44, 0.0 }
 0x2cb   : > { %v401_v47 = vsel %vm290_vm7, %v400_v46, 0.0 }
 0x2cc   : > { %402 = vadd.xlane.f32.xlu1 %v401_v47 }
 0x355   : > { %v403_v48 = vpop.xlane.xlu1 %402 }
 0x356   : > { %v404_v49 = vrot.slane %v403_v48, 4 }
 0x358   : > { %v405_v50 = vadd.f32 %v404_v49, %v403_v48 }
 0x35a   : > { %v406_v51 = vrot.slane %v405_v50, 2 }
 0x35c   : > { %v407_v52 = vadd.f32 %v406_v51, %v405_v50 }
 0x35e   : > { %v408_v53 = vrot.slane %v407_v52, 1 }
 0x360   : > { %v409_v54 = vadd.f32 %v408_v53, %v407_v52 }
 0x362   : > { %598 = vpush %v409_v54 }
 0x393   : > { %s599_s2 = spop %598 }
 0x394   : > { %s557_s21 = sadd.f32 -0.5, %s599_s2 }
 0x396   : > { %s1172_s21 = smov (!%p411_p10, %s557_s21), 0.0 }
 0x397   : > { %v417_v55 = vstv %s1172_s21 }
 0x398   : > { %v418_v57 = vsel %vm416_vm15, %v417_v55, 0.0 }
 0x399   : > { %v420_v59 = vsel %vm415_vm0, %v419_v56, %v418_v57 }
 0x39a   : > { %v422_v60 = vsel %vm414_vm1, %v421_v58, %v420_v59 }
 0x39b   : > { %423 = vst [vmem:[%s239_s20] sm:$0xff] %v422_v60 }
 0x39c   : > { %749 = shalt.err (!%p746_p5)
}
 0x39d   : > { %s750_s8 = scalar_lea.hbm %s1092_s27, 128  ;;  %s754_s11 = scalar_lea.hbm %s1132_s3, 256 }
 0x39e   : > { %p751_p13 = scmp.ne.s32.totalorder %s1092_s27, %s750_s8  ;;  %p755_p8 = scmp.lt.s32.totalorder %s1092_s27, %s1132_s3 }
 0x39f   : > { %p756_p9 = scmp.lt.s32.totalorder %s754_s11, %s750_s8 }
 0x3a0   : > { %p752_p3 = pnand %p751_p13, %p1161_p4 }
 0x3a1   : > { %p757_p10 = por %p756_p9, %p755_p8 }
 0x3a2   : > { %p753_p7 = pneg %p752_p3 }
 0x3a4   : > { %p758_p1 = pnand %p757_p10, %p753_p7 }
 0x3a6   : > { %761 = shalt.err (!%p758_p1)
}
 0x3a7   : > { %608 = dma.vmem_to_hbm [thread:$0]  (%p1161_p4), %s439_s22, 128, %s1092_s27, %s425_s28  }
 0x3a8 PF: > { %s450_s9 = sand.u32 1, %s796_s12   ;;  %p1162_p11 = scmp.ne.s32.totalorder %s1144_s25, 0 }
 0x3a9   : > { %p1163_p0 = scmp.ge.s32.totalorder %s808_s15, 2  ;;  %s451_s0 = scalar_lea.sflag [#allocation4], %s450_s9 }
 0x3ab   : > { %p622_p6 = pnand %p1163_p0, %p1162_p11 }
 0x3ad   : > { %p623_p12 = pneg %p622_p6 }
 0x3af   : > { %791 = dma.done.wait (%p623_p12), %s451_s0, 128  }
 0x3b0   : > { %793 = vsyncadd (%p623_p12), %s451_s0, 4294967168  ;;  %s1164_s1 = sld [smem:[#allocation14_spill]]  ;;  %p20_p2 = scmp.ge.s32.totalorder %s862_s18, 4  }
 0x3b1   : > { %s1165_s12 = smov %s800_s13  ;;  %s1166_s13 = smov %s804_s14 }
 0x3b2   : > { %s1168_s15 = smov %s862_s18  ;;  %22 = sbr.rel (!%p20_p2) target bundleno = 12 (0xc), region = 95 }
 0x3b6   : > { %s1167_s14 = smov %s1164_s1 }
 0x3b7   :  { %456 = vsyncpa [#allocation3], 1 }
 0x3b8   :  { %458 = vsyncpa [#allocation3 + $0x1], 1 }
 0x3b9   :  { %459 = vsyncpa [#allocation7], 1 }
 0x3ba   :  { %461 = vsyncpa [#allocation7 + $0x1], 1 }
 0x3bb   :  { %462 = vsyncpa [#allocation4], 1 }
 0x3bc   :  { %464 = vsyncpa [#allocation4 + $0x1], 1 }
 0x3bd   :  { %465 = vsyncpa [#allocation5], 1 }
 0x3be   :  { %467 = vsyncpa [#allocation5 + $0x1], 1 }

</bundles_post_ra>
